<compile_context>
chip_gen: v5e
topology: v5e:2x2
jax: 0.10.0
libtpu: 0.0.40
codegen_flags: <defaults>
</compile_context>

<pallas_src>
import functools
from math import gcd

import numpy as np
import jax
import jax.numpy as jnp
from jax.experimental import pallas as pl
from jax.experimental.pallas import tpu as pltpu


def _linear_gn_relu_kernel(x_ref, wt_ref, gamma_ref, beta_ref, m_ref, mt_ref,
                           o_ref, *, inv_group_size, eps, act):
    # x_ref:  (TN, n_in)        wt_ref: (n_in, n_out)
    # gamma_ref/beta_ref: (1, n_out)
    # m_ref:  (n_out, G)  membership (channel -> group, one-hot)
    # mt_ref: (G, n_out)  its transpose (group -> channels broadcast)
    # o_ref:  (TN, n_out)
    x = x_ref[...]
    wt = wt_ref[...]

    # Linear (no bias) on the MXU; accumulate in f32.
    y = jnp.dot(x, wt, preferred_element_type=jnp.float32)          # (TN, C)

    m = m_ref[...]                                                   # (C, G)
    mt = mt_ref[...]                                                 # (G, C)

    # Per-(sample, group) mean.
    sum_g = jnp.dot(y, m, preferred_element_type=jnp.float32)        # (TN, G)
    mean_g = sum_g * inv_group_size
    mean_c = jnp.dot(mean_g, mt, preferred_element_type=jnp.float32)  # (TN, C)

    # Numerically stable (two-pass) variance: mean of centered squares.
    centered = y - mean_c
    var_g = jnp.dot(centered * centered, m,
                    preferred_element_type=jnp.float32) * inv_group_size
    inv_std_g = jax.lax.rsqrt(var_g + eps)                           # (TN, G)
    inv_std_c = jnp.dot(inv_std_g, mt, preferred_element_type=jnp.float32)

    # Fused normalize + affine (+ ReLU) epilogue on the VPU.
    out = centered * inv_std_c * gamma_ref[...] + beta_ref[...]
    if act:
        out = jnp.maximum(out, 0.0)
    o_ref[...] = out.astype(o_ref.dtype)


def linear_gn_relu(x, w, gamma, beta, *, ng=32, eps=1e-5, act=True,
                   tile_n=256):
    """out = ReLU(GroupNorm(x @ W^T)).

    x: (N, n_in);  w: (n_out, n_in) (PyTorch nn.Linear layout);
    gamma/beta: (n_out,) GroupNorm affine params.
    """
    N, n_in = x.shape
    n_out = w.shape[0]
    num_groups = gcd(ng, n_out)
    group_size = n_out // num_groups

    # ---- batch tiling: pad N up to a multiple of the row tile --------------
    if N <= tile_n:
        tn = max(8, ((N + 7) // 8) * 8)          # sublane-aligned single tile
    else:
        tn = tile_n
    n_pad = ((N + tn - 1) // tn) * tn
    xp = x if n_pad == N else jnp.pad(x, ((0, n_pad - N), (0, 0)))
    grid = (n_pad // tn,)

    # ---- one-time host/XLA-side prep ---------------------------------------
    wt = jnp.asarray(w).T                         # (n_in, n_out), no in-kernel .T
    gamma2 = jnp.asarray(gamma, jnp.float32).reshape(1, n_out)
    beta2 = jnp.asarray(beta, jnp.float32).reshape(1, n_out)

    # Group membership matrix built once (hoisted out of the kernel body).
    ch = np.arange(n_out)
    m_np = (ch[:, None] // group_size ==
            np.arange(num_groups)[None, :]).astype(np.float32)       # (C, G)
    m_in = jnp.asarray(m_np)
    mt_in = jnp.asarray(m_np.T)                                      # (G, C)

    kernel = functools.partial(
        _linear_gn_relu_kernel,
        inv_group_size=1.0 / float(group_size), eps=float(eps), act=act)

    flops = 2 * n_pad * n_in * n_out + 6 * n_pad * n_out * num_groups
    bytes_accessed = 4 * (n_pad * n_in + n_in * n_out + 2 * n_out
                          + n_pad * n_out)

    out = pl.pallas_call(
        kernel,
        out_shape=jax.ShapeDtypeStruct((n_pad, n_out), x.dtype),
        grid=grid,
        in_specs=[
            pl.BlockSpec((tn, n_in), lambda i: (i, 0)),         # x: row tiles
            pl.BlockSpec((n_in, n_out), lambda i: (0, 0)),      # W^T: resident
            pl.BlockSpec((1, n_out), lambda i: (0, 0)),         # gamma
            pl.BlockSpec((1, n_out), lambda i: (0, 0)),         # beta
            pl.BlockSpec((n_out, num_groups), lambda i: (0, 0)),  # M
            pl.BlockSpec((num_groups, n_out), lambda i: (0, 0)),  # M^T
        ],
        out_specs=pl.BlockSpec((tn, n_out), lambda i: (i, 0)),
        compiler_params=pltpu.CompilerParams(
            dimension_semantics=("parallel",)),
        cost_estimate=pl.CostEstimate(
            flops=flops,
            transcendentals=n_pad * num_groups,
            bytes_accessed=bytes_accessed),
    )(xp, wt, gamma2, beta2, m_in, mt_in)

    return out[:N] if n_pad != N else out


def _reference(x, w, gamma, beta, *, ng=32, eps=1e-5, act=True):
    N, _ = x.shape
    n_out = w.shape[0]
    g = gcd(ng, n_out)
    y = x @ w.T
    yr = y.reshape(N, g, n_out // g)
    mean = yr.mean(axis=-1, keepdims=True)
    var = yr.var(axis=-1, keepdims=True)
    yn = ((yr - mean) / jnp.sqrt(var + eps)).reshape(N, n_out)
    out = yn * gamma[None, :] + beta[None, :]
    if act:
        out = jnp.maximum(out, 0.0)
    return out


if __name__ == "__main__":
    # Shapes consistent with the module: n_in=32, n_out=64, ng=32
    # -> GroupNorm with gcd(32, 64) = 32 groups of 2 channels each.
    n_in, n_out, ng = 32, 64, 32

    key = jax.random.PRNGKey(0)
    kx, kw, kx2 = jax.random.split(key, 3)
    bound = 1.0 / (n_in ** 0.5)
    w = jax.random.uniform(kw, (n_out, n_in), minval=-bound, maxval=bound,
                           dtype=jnp.float32)
    gamma = jnp.ones((n_out,), dtype=jnp.float32)       # PyTorch GN defaults
    beta = jnp.zeros((n_out,), dtype=jnp.float32)

    # Case 1: tiny batch (single tile).
    N1 = 8
    x1 = jax.random.normal(kx, (N1, n_in), dtype=jnp.float32)
    out1 = jax.block_until_ready(linear_gn_relu(x1, w, gamma, beta, ng=ng))
    ref1 = _reference(x1, w, gamma, beta, ng=ng)
    assert out1.shape == (N1, n_out)
    assert jnp.allclose(out1, ref1, atol=1e-4, rtol=1e-4), \
        float(jnp.max(jnp.abs(out1 - ref1)))

    # Case 2: batch that exercises the N grid + padding (tile_n=16, N=40).
    N2 = 40
    x2 = jax.random.normal(kx2, (N2, n_in), dtype=jnp.float32)
    out2 = jax.block_until_ready(
        linear_gn_relu(x2, w, gamma, beta, ng=ng, tile_n=16))
    ref2 = _reference(x2, w, gamma, beta, ng=ng)
    assert out2.shape == (N2, n_out)
    assert jnp.allclose(out2, ref2, atol=1e-4, rtol=1e-4), \
        float(jnp.max(jnp.abs(out2 - ref2)))

    print("KERNEL_OK")
</pallas_src>

<mosaic_0001>
module attributes {stable_mosaic.version = 11 : i64} {
  func.func @_linear_gn_relu_kernel(%arg0: i32, %arg1: memref<8x32xf32, #tpu.memory_space<vmem>>, %arg2: memref<32x64xf32, #tpu.memory_space<vmem>>, %arg3: memref<1x64xf32, #tpu.memory_space<vmem>>, %arg4: memref<1x64xf32, #tpu.memory_space<vmem>>, %arg5: memref<64x32xf32, #tpu.memory_space<vmem>>, %arg6: memref<32x64xf32, #tpu.memory_space<vmem>>, %arg7: memref<8x64xf32, #tpu.memory_space<vmem>>) attributes {dimension_semantics = [#tpu.dimension_semantics<parallel>], iteration_bounds = array<i64: 1>, scalar_prefetch = 0 : i64, scratch_operands = 0 : i64, tpu.core_type = #tpu.core_type<tc>, window_params = [{transform_indices = @transform_0, window_bounds = array<i64: 8, 32>}, {pipeline_mode = #tpu.pipeline_mode<synchronous>, transform_indices = @transform_1, window_bounds = array<i64: 32, 64>}, {pipeline_mode = #tpu.pipeline_mode<synchronous>, transform_indices = @transform_2, window_bounds = array<i64: 1, 64>}, {pipeline_mode = #tpu.pipeline_mode<synchronous>, transform_indices = @transform_3, window_bounds = array<i64: 1, 64>}, {pipeline_mode = #tpu.pipeline_mode<synchronous>, transform_indices = @transform_4, window_bounds = array<i64: 64, 32>}, {pipeline_mode = #tpu.pipeline_mode<synchronous>, transform_indices = @transform_5, window_bounds = array<i64: 32, 64>}, {transform_indices = @transform_6, window_bounds = array<i64: 8, 64>}]} {
    %c0 = arith.constant 0 : index
    %c0_0 = arith.constant 0 : index
    %0 = vector.load %arg1[%c0, %c0_0] : memref<8x32xf32, #tpu.memory_space<vmem>>, vector<8x32xf32>
    %c0_1 = arith.constant 0 : index
    %c0_2 = arith.constant 0 : index
    %1 = vector.load %arg2[%c0_1, %c0_2] : memref<32x64xf32, #tpu.memory_space<vmem>>, vector<32x64xf32>
    %cst = arith.constant dense<0.000000e+00> : vector<8x64xf32>
    %2 = tpu.matmul %0, %1, %cst {dimension_numbers = #tpu.dot_dimension_numbers<[1], [0], [0], [1], [0, 0, 1, 1], [], []>} : vector<8x32xf32>, vector<32x64xf32>, vector<8x64xf32> -> vector<8x64xf32>
    %c0_3 = arith.constant 0 : index
    %c0_4 = arith.constant 0 : index
    %3 = vector.load %arg5[%c0_3, %c0_4] : memref<64x32xf32, #tpu.memory_space<vmem>>, vector<64x32xf32>
    %c0_5 = arith.constant 0 : index
    %c0_6 = arith.constant 0 : index
    %4 = vector.load %arg6[%c0_5, %c0_6] : memref<32x64xf32, #tpu.memory_space<vmem>>, vector<32x64xf32>
    %cst_7 = arith.constant dense<0.000000e+00> : vector<8x32xf32>
    %5 = tpu.matmul %2, %3, %cst_7 {dimension_numbers = #tpu.dot_dimension_numbers<[1], [0], [0], [1], [0, 0, 1, 1], [], []>} : vector<8x64xf32>, vector<64x32xf32>, vector<8x32xf32> -> vector<8x32xf32>
    %cst_8 = arith.constant 5.000000e-01 : f32
    %6 = vector.broadcast %cst_8 : f32 to vector<8x32xf32>
    %7 = arith.mulf %5, %6 : vector<8x32xf32>
    %cst_9 = arith.constant dense<0.000000e+00> : vector<8x64xf32>
    %8 = tpu.matmul %7, %4, %cst_9 {dimension_numbers = #tpu.dot_dimension_numbers<[1], [0], [0], [1], [0, 0, 1, 1], [], []>} : vector<8x32xf32>, vector<32x64xf32>, vector<8x64xf32> -> vector<8x64xf32>
    %9 = arith.subf %2, %8 : vector<8x64xf32>
    %10 = arith.mulf %9, %9 : vector<8x64xf32>
    %cst_10 = arith.constant dense<0.000000e+00> : vector<8x32xf32>
    %11 = tpu.matmul %10, %3, %cst_10 {dimension_numbers = #tpu.dot_dimension_numbers<[1], [0], [0], [1], [0, 0, 1, 1], [], []>} : vector<8x64xf32>, vector<64x32xf32>, vector<8x32xf32> -> vector<8x32xf32>
    %cst_11 = arith.constant 5.000000e-01 : f32
    %12 = vector.broadcast %cst_11 : f32 to vector<8x32xf32>
    %13 = arith.mulf %11, %12 : vector<8x32xf32>
    %cst_12 = arith.constant 9.99999974E-6 : f32
    %14 = vector.broadcast %cst_12 : f32 to vector<8x32xf32>
    %15 = arith.addf %13, %14 : vector<8x32xf32>
    %16 = math.rsqrt %15 : vector<8x32xf32>
    %cst_13 = arith.constant dense<0.000000e+00> : vector<8x64xf32>
    %17 = tpu.matmul %16, %4, %cst_13 {dimension_numbers = #tpu.dot_dimension_numbers<[1], [0], [0], [1], [0, 0, 1, 1], [], []>} : vector<8x32xf32>, vector<32x64xf32>, vector<8x64xf32> -> vector<8x64xf32>
    %18 = arith.mulf %9, %17 : vector<8x64xf32>
    %c0_14 = arith.constant 0 : index
    %c0_15 = arith.constant 0 : index
    %19 = vector.load %arg3[%c0_14, %c0_15] : memref<1x64xf32, #tpu.memory_space<vmem>>, vector<1x64xf32>
    %20 = vector.broadcast %19 : vector<1x64xf32> to vector<8x64xf32>
    %21 = arith.mulf %18, %20 : vector<8x64xf32>
    %c0_16 = arith.constant 0 : index
    %c0_17 = arith.constant 0 : index
    %22 = vector.load %arg4[%c0_16, %c0_17] : memref<1x64xf32, #tpu.memory_space<vmem>>, vector<1x64xf32>
    %23 = vector.broadcast %22 : vector<1x64xf32> to vector<8x64xf32>
    %24 = arith.addf %21, %23 : vector<8x64xf32>
    %cst_18 = arith.constant 0.000000e+00 : f32
    %25 = vector.broadcast %cst_18 : f32 to vector<8x64xf32>
    %26 = arith.maximumf %24, %25 : vector<8x64xf32>
    %c0_19 = arith.constant 0 : index
    %c0_20 = arith.constant 0 : index
    %27 = vector.load %arg7[%c0_19, %c0_20] : memref<8x64xf32, #tpu.memory_space<vmem>>, vector<8x64xf32>
    tpu.vector_store %arg7[%c0_19, %c0_20], %26 {strides = array<i32>} : memref<8x64xf32, #tpu.memory_space<vmem>>, vector<8x64xf32>,
    return
  }
  func.func @transform_0(%arg0: i32) -> (i32, i32) {
    %c0_i32 = arith.constant 0 : i32
    %c0_i32_0 = arith.constant 0 : i32
    return %arg0, %c0_i32 : i32, i32
  }
  func.func @transform_1(%arg0: i32) -> (i32, i32) {
    %c0_i32 = arith.constant 0 : i32
    %c0_i32_0 = arith.constant 0 : i32
    %c0_i32_1 = arith.constant 0 : i32
    return %c0_i32, %c0_i32_0 : i32, i32
  }
  func.func @transform_2(%arg0: i32) -> (i32, i32) {
    %c0_i32 = arith.constant 0 : i32
    %c0_i32_0 = arith.constant 0 : i32
    %c0_i32_1 = arith.constant 0 : i32
    return %c0_i32, %c0_i32_0 : i32, i32
  }
  func.func @transform_3(%arg0: i32) -> (i32, i32) {
    %c0_i32 = arith.constant 0 : i32
    %c0_i32_0 = arith.constant 0 : i32
    %c0_i32_1 = arith.constant 0 : i32
    return %c0_i32, %c0_i32_0 : i32, i32
  }
  func.func @transform_4(%arg0: i32) -> (i32, i32) {
    %c0_i32 = arith.constant 0 : i32
    %c0_i32_0 = arith.constant 0 : i32
    %c0_i32_1 = arith.constant 0 : i32
    return %c0_i32, %c0_i32_0 : i32, i32
  }
  func.func @transform_5(%arg0: i32) -> (i32, i32) {
    %c0_i32 = arith.constant 0 : i32
    %c0_i32_0 = arith.constant 0 : i32
    %c0_i32_1 = arith.constant 0 : i32
    return %c0_i32, %c0_i32_0 : i32, i32
  }
  func.func @transform_6(%arg0: i32) -> (i32, i32) {
    %c0_i32 = arith.constant 0 : i32
    %c0_i32_0 = arith.constant 0 : i32
    return %arg0, %c0_i32 : i32, i32
  }
}

</mosaic_0001>

<bundles_post_ra>
// kernel: tpu_custom_call.1
= control target key start
LH: loop header
LB: loop body
LE: loop exit
PB: predicated region body
PF: predicated region fallthrough
CT: control target
= control target key end

     0   :  { %s340_s0 = inlined_call_operand.vmem [shape: f32[8,32], index: 0, kind: input, shape index: {}]   ;;  %s341_s1 = inlined_call_operand.vmem [shape: f32[32,64], index: 1, kind: input, shape index: {}]   ;;  %s342_s2 = inlined_call_operand.vmem [shape: f32[1,64], index: 2, kind: input, shape index: {}]   ;;  %s343_s3 = inlined_call_operand.vmem [shape: f32[1,64], index: 3, kind: input, shape index: {}]   ;;  %s344_s4 = inlined_call_operand.vmem [shape: f32[64,32], index: 4, kind: input, shape index: {}]   ;;  %s345_s5 = inlined_call_operand.vmem [shape: f32[32,64], index: 5, kind: input, shape index: {}]   ;;  %s346_s6 = inlined_call_operand.hbm [shape: f32[8,64], index: 6, kind: output, shape index: {}]  }
   0x1   :  { %v28_v0 = vld [vmem:[%s341_s1 + $0x18] sm:$0xff]  ;;  %v27_v1 = vld [vmem:[%s341_s1 + $0x10] sm:$0xff]  ;;  %v26_v3 = vld [vmem:[%s341_s1 + $0x8] sm:$0xff] }
   0x2   :  { %45 = vmatpush.msra.mxu0 %v28_v0  ;;  %v60_v2 = vld [vmem:[%s344_s4 + $0x38] sm:$0xff]  ;;  %v59_v4 = vld [vmem:[%s344_s4 + $0x30] sm:$0xff]  ;;  %v25_v5 = vld [vmem:[%s341_s1] sm:$0xff] }
   0x3   :  { %77 = vmatpush.msra.mxu1 %v60_v2  ;;  %126 = vmatpush.msra.mxu3 %v60_v2  ;;  %v58_v6 = vld [vmem:[%s344_s4 + $0x28] sm:$0xff] }
   0x4   :  { %46 = vmatpush.msra.mxu0 %v27_v1 }
   0x5   :  { %78 = vmatpush.msra.mxu1 %v59_v4  ;;  %127 = vmatpush.msra.mxu3 %v59_v4 }
   0x6   :  { %11 = vsyncpa [#allocation3], 0  ;;  %47 = vmatpush.msra.mxu0 %v26_v3  ;;  %v24_v7 = vld [vmem:[%s340_s0] sm:$0xff]  ;;  %vm29_vm0 = vcmask 261120   ;;  %v56_v9 = vld [vmem:[%s344_s4 + $0x18] sm:$0xff]  ;;  %vm65_vm1 = vcmask 523264  }
   0x7   :  { %v57_v8 = vld [vmem:[%s344_s4 + $0x20] sm:$0xff]  ;;  %79 = vmatpush.msra.mxu1 %v58_v6  ;;  %128 = vmatpush.msra.mxu3 %v58_v6  ;;  %v55_v10 = vld [vmem:[%s344_s4 + $0x10] sm:$0xff]  ;;  %v54_v11 = vld [vmem:[%s344_s4 + $0x8] sm:$0xff]  ;;  %s238_s7 = smov [#allocation2]   ;;  %s193_s11 = sshll.u32 %s346_s6, 4  ;;  %s194_s11 = int_to_ptr.hbm [resolvable:$true] %s193_s11 }
   0x8   :  { %48 = vmatpush.msra.mxu0 %v25_v5  ;;  %v53_v12 = vld [vmem:[%s344_s4] sm:$0xff]  ;;  %v64_v13 = vld [vmem:[%s345_s5 + $0x18] sm:$0xff]  ;;  %v63_v14 = vld [vmem:[%s345_s5 + $0x10] sm:$0xff]  ;;  %s191_s8 = sshll.u32 %s238_s7, 4  ;;  %s192_s8 = int_to_ptr.vmem [resolvable:$true] %s191_s8 }
   0x9   :  { %202 = vmatmul.msk.f32.vlgmr.msra.gmra.mxu0 %vm29_vm0, %v24_v7  ;;  %80 = vmatpush.msra.mxu1 %v57_v8  ;;  %v62_v16 = vld [vmem:[%s345_s5 + $0x8] sm:$0xff]  ;;  %v61_v17 = vld [vmem:[%s345_s5] sm:$0xff] }
   0xa   :  { %129 = vmatpush.msra.mxu3 %v57_v8  ;;  %105 = vmatpush.msra.mxu2 %v64_v13  ;;  %v208_v33 = vld [vmem:[%s342_s2] ss:$0 sm:$0xff] }
   0xb   :  { %81 = vmatpush.msra.mxu1 %v56_v9  ;;  %165 = vmatpush.msrb.mxu0 %v64_v13  ;;  %v209_v36 = vld [vmem:[%s343_s3] ss:$0 sm:$0xff] }
   0xc   :  { %130 = vmatpush.msra.mxu3 %v56_v9  ;;  %106 = vmatpush.msra.mxu2 %v63_v14 }
   0xd   :  { %82 = vmatpush.msra.mxu1 %v55_v10  ;;  %166 = vmatpush.msrb.mxu0 %v63_v14 }
   0xe   :  { %131 = vmatpush.msra.mxu3 %v55_v10  ;;  %107 = vmatpush.msra.mxu2 %v62_v16 }
   0xf   :  { %83 = vmatpush.msra.mxu1 %v54_v11  ;;  %167 = vmatpush.msrb.mxu0 %v62_v16 }
  0x10   :  { %132 = vmatpush.msra.mxu3 %v54_v11  ;;  %108 = vmatpush.msra.mxu2 %v61_v17 }
  0x11   :  { %84 = vmatpush.msra.mxu1 %v53_v12  ;;  %168 = vmatpush.msrb.mxu0 %v61_v17 }
  0x12   :  { %133 = vmatpush.msra.mxu3 %v53_v12 }
  0x86   :  { %v50_v15 = vpop.f32.mrf.mxu0 }
  0x87   :  { %203 = vmatmul.msk.f32.vlgmr.msra.gmra.mxu1 %vm65_vm1, %v50_v15 }
 0x104   :  { %v86_v18 = vpop.f32.mrf.mxu1 }
 0x105   :  { %v89_v19 = vmul.f32 0.5, %v86_v18 }
 0x107   :  { %204 = vmatmul.msk.f32.vlgmr.msra.gmra.mxu2 %vm29_vm0, %v89_v19 }
 0x18a   :  { %v110_v20 = vpop.f32.mrf.mxu2 }
 0x18b   :  { %v113_v21 = vsub.f32 %v50_v15, %v110_v20 }
 0x18d   :  { %v114_v22 = vmul.f32 %v113_v21, %v113_v21 }
 0x18f   :  { %205 = vmatmul.msk.f32.vlgmr.msra.gmra.mxu3 %vm65_vm1, %v114_v22 }
 0x212   :  { %v135_v23 = vpop.f32.mrf.mxu3 }
 0x213   :  { %v138_v24 = vmul.f32 0.5, %v135_v23 }
 0x215   :  { %v139_v25 = vadd.f32 1e-05, %v138_v24 }
 0x217   :  { %210 = vrsqrt.f32 %v139_v25  ;;  %vm146_vm3 = vweird.f32 %v139_v25 }
 0x21d   :  { %v211_v26 = vpop.eup %210 }
 0x21e   :  { %v141_v27 = vmul.f32 %v211_v26, %v139_v25  ;;  %vm147_vm2 = vweird.f32 %v211_v26 }
 0x21f   :  { %vm148_vm4 = vmor %vm146_vm3, %vm147_vm2 }
 0x220   :  { %v142_v28 = vmul.f32 %v211_v26, %v141_v27 }
 0x222   :  { %v143_v29 = vmul.f32 0.5, %v142_v28 }
 0x224   :  { %v144_v30 = vsub.f32 1.5, %v143_v29 }
 0x226   :  { %v145_v31 = vmul.f32 %v211_v26, %v144_v30 }
 0x228   :  { %v149_v32 = vsel %vm148_vm4, %v211_v26, %v145_v31 }
 0x229   :  { %206 = vmatmul.msk.f32.vlgmr.msrb.gmra.mxu0 %vm29_vm0, %v149_v32 }
 0x2a6   :  { %v170_v34 = vpop.f32.mrf.mxu0 }
 0x2a7   :  { %v173_v35 = vmul.f32 %v170_v34, %v113_v21 }
 0x2a9   :  { %v178_v37 = vmul.f32 %v208_v33, %v173_v35 }
 0x2ab   :  { %v183_v38 = vadd.f32 %v209_v36, %v178_v37 }
 0x2ad   :  { %v184_v39 = vmax.f32 %v183_v38, 0.0 }
 0x2af   :  { %185 = vst.msk [vmem:[#allocation2] sm:$0xff] %vm65_vm1, %v184_v39 }
 0x2b0   :  { %196 = dma.vmem_to_hbm [thread:$0]  %s192_s8, 128, %s194_s11, [#allocation3]  }
 0x2b1   :  { %236 = dma.done.wait [#allocation3], 128  }
 0x2b2   :  { %237 = vsyncadd [#allocation3], 4294967168 }
 0x2b3   :  { %201 = vsyncpa [#allocation3], 1 }

</bundles_post_ra>
